<compile_context>
chip_gen: v6e
topology: v6e:2x2x1
jax: 0.10.0
libtpu: 0.0.40
codegen_flags: <defaults>
</compile_context>

<pallas_src>
import functools

import jax
import jax.numpy as jnp
from jax import lax
from jax.experimental import pallas as pl
from jax.experimental.pallas import tpu as pltpu


# ----------------------------- fused Pallas kernel -----------------------------

def _duad_kernel(xcol_ref, xph_ref, w1_ref, b1_ref, wenc_ref, benc_ref,
                 wdec_ref, bdec_ref, wph_ref, bph_ref, zc_ref, zr_ref, *, L):
    """One grid step == one batch element.  Everything stays in VMEM."""
    xcol = xcol_ref[0]                      # (9*C, OP)  im2col taps
    xph = xph_ref[0]                        # (4*C, OP)  x split by output phase

    # ---- encoder Conv2d (stride 2, pad 1, k3) as one GEMM + ReLU
    h = jnp.dot(w1_ref[...], xcol, preferred_element_type=jnp.float32) + b1_ref[...]
    h = jnp.maximum(h, 0.0)                 # (Cmid, OP)

    # ---- enc_fc : z_c[l] = <Wenc[l], h> + b
    pe = wenc_ref[...] * h[None]            # (L, Cmid, OP)
    zc = (pe.sum(axis=2, keepdims=True)
            .sum(axis=1, keepdims=True)) + benc_ref[...]        # (L, 1, 1)
    zc_ref[0] = zc

    # ---- dec_fc + ReLU, evaluated at the 4 sub-pixel shifts (A, B:ow+1,
    #      C:oh+1, D:both) in one shot; shifted weights/biases are zero-padded
    #      at init so out-of-range positions are exact zeros (relu(0) == 0).
    hpre = bdec_ref[...]                    # (4*Cmid, OP)
    for l in range(L):
        hpre = hpre + wdec_ref[l] * zc[l, 0, 0]
    hdec = jnp.maximum(hpre, 0.0)           # (4*Cmid, OP) == [A; B; C; D]

    # ---- ConvTranspose2d(k3, s2, p1, out_pad 1) via its 4-output-phase
    #      (sub-pixel) decomposition: a single GEMM against stacked weights.
    out = jnp.dot(wph_ref[...], hdec, preferred_element_type=jnp.float32) + bph_ref[...]
    # out: (4*C, OP), rows = phase-major reconstruction, aligned with xph.

    # ---- cosine-similarity head
    dotv = jnp.sum(xph * out)
    nx2 = jnp.sum(xph * xph)
    ny2 = jnp.sum(out * out)
    eps = jnp.float32(1e-8)
    zr = dotv * lax.rsqrt(jnp.maximum(nx2 * ny2, eps * eps))
    zr_ref[...] = jnp.broadcast_to(zr, (1, 1, 1))


# ----------------------------- parameter packing (once, at init) -----------------------------

def prepare_kernel_params(params):
    """Hoist all weight transposes/reshapes/shift-padding out of the forward."""
    conv_w = params["conv_w"].astype(jnp.float32)     # (Cmid, C, 3, 3)
    conv_b = params["conv_b"].astype(jnp.float32)     # (Cmid,)
    enc_w = params["enc_fc_w"].astype(jnp.float32)    # (L, Cmid*OH*OW)
    enc_b = params["enc_fc_b"].astype(jnp.float32)    # (L,)
    dec_w = params["dec_fc_w"].astype(jnp.float32)    # (Cmid*OH*OW, L)
    dec_b = params["dec_fc_b"].astype(jnp.float32)    # (Cmid*OH*OW,)
    dw = params["deconv_w"].astype(jnp.float32)       # (Cmid, C, 3, 3)
    db = params["deconv_b"].astype(jnp.float32)       # (C,)

    Cmid, C, kh, kw = conv_w.shape
    L, F = enc_w.shape
    OH = OW = int(round((F // Cmid) ** 0.5))
    OP = OH * OW
    assert kh == 3 and kw == 3 and Cmid * OP == F

    # encoder conv as a GEMM over the 9*C taps: w1[cm, t*C + c] = conv_w[cm,c,ki,kj]
    w1 = conv_w.transpose(0, 2, 3, 1).reshape(Cmid, 9 * C)
    b1 = conv_b.reshape(Cmid, 1)

    # enc_fc weights, latent-major: wenc[l, cm, p]
    wenc = enc_w.reshape(L, Cmid, OP)
    benc = enc_b.reshape(L, 1, 1)

    # dec_fc weights: four pre-shifted, zero-padded copies A, B(ow+1), C(oh+1), D(both)
    dwr = dec_w.reshape(Cmid, OH, OW, L)
    dbr = dec_b.reshape(Cmid, OH, OW)

    def shifted(dr, dc):
        w, b = dwr, dbr
        if dr:
            w = jnp.pad(w[:, 1:], ((0, 0), (0, 1), (0, 0), (0, 0)))
            b = jnp.pad(b[:, 1:], ((0, 0), (0, 1), (0, 0)))
        if dc:
            w = jnp.pad(w[:, :, 1:], ((0, 0), (0, 0), (0, 1), (0, 0)))
            b = jnp.pad(b[:, :, 1:], ((0, 0), (0, 0), (0, 1)))
        return (w.transpose(3, 0, 1, 2).reshape(L, Cmid, OP),    # [l, cm, p]
                b.reshape(Cmid, OP))

    shifts = [(0, 0), (0, 1), (1, 0), (1, 1)]                    # A, B, C, D
    ws, bs = zip(*(shifted(dr, dc) for dr, dc in shifts))
    wdec = jnp.concatenate(ws, axis=1)                           # (L, 4*Cmid, OP)
    bdec = jnp.concatenate(bs, axis=0)                           # (4*Cmid, OP)

    # deconv output-phase GEMM weights: out[ph*C+c, p] = wph @ [A;B;C;D]
    # phase ph = 2*pi + pj; contributions (shift s, ki, kj):
    contrib = {
        0: [(0, 1, 1)],
        1: [(0, 1, 2), (1, 1, 0)],
        2: [(0, 2, 1), (2, 0, 1)],
        3: [(0, 2, 2), (1, 2, 0), (2, 0, 2), (3, 0, 0)],
    }
    wph = jnp.zeros((4 * C, 4 * Cmid), jnp.float32)
    for ph, lst in contrib.items():
        for s, ki, kj in lst:
            wph = wph.at[ph * C:(ph + 1) * C, s * Cmid:(s + 1) * Cmid].set(
                dw[:, :, ki, kj].T)
    bph = jnp.tile(db, 4).reshape(4 * C, 1)

    kparams = dict(w1=w1, b1=b1, wenc=wenc, benc=benc,
                   wdec=wdec, bdec=bdec, wph=wph, bph=bph)
    dims = (C, Cmid, L, OH, OW)
    return kparams, dims


# ----------------------------- forward wrapper -----------------------------

@functools.partial(jax.jit, static_argnums=(2,))
def duad_forward(x, kparams, dims):
    C, Cmid, L, OH, OW = dims
    B, Cx, H, W = x.shape
    assert Cx == C and H == 2 * OH and W == 2 * OW
    OP = OH * OW
    x = x.astype(jnp.float32)

    # ---- pure layout glue (no arithmetic), fused into this jit:
    # im2col taps of the padded input + output-phase split of the raw input.
    xpad = jnp.pad(x, ((0, 0), (0, 0), (1, 1), (1, 1)))
    taps = [xpad[:, :, ki:ki + H:2, kj:kj + W:2]
            for ki in range(3) for kj in range(3)]
    xcol = jnp.stack(taps, axis=1).reshape(B, 9 * C, OP)          # [b, t*C+c, p]
    xph = (x.reshape(B, C, OH, 2, OW, 2)
             .transpose(0, 3, 5, 1, 2, 4)
             .reshape(B, 4 * C, OP))                              # [b, ph*C+c, p]

    kp = kparams
    kernel = functools.partial(_duad_kernel, L=L)

    def fullspec(a):
        n = a.ndim
        return pl.BlockSpec(a.shape, lambda b, _n=n: (0,) * _n)

    flops = 2 * B * (Cmid * 9 * C * OP + L * Cmid * OP + L * 4 * Cmid * OP
                     + 4 * C * 4 * Cmid * OP + 3 * 4 * C * OP)
    bytes_accessed = 4 * (int(xcol.size) + int(xph.size)
                          + sum(int(v.size) for v in kp.values()) + B * (L + 1))

    zc4, zr3 = pl.pallas_call(
        kernel,
        grid=(B,),
        in_specs=[
            pl.BlockSpec((1, 9 * C, OP), lambda b: (b, 0, 0)),
            pl.BlockSpec((1, 4 * C, OP), lambda b: (b, 0, 0)),
            fullspec(kp["w1"]), fullspec(kp["b1"]),
            fullspec(kp["wenc"]), fullspec(kp["benc"]),
            fullspec(kp["wdec"]), fullspec(kp["bdec"]),
            fullspec(kp["wph"]), fullspec(kp["bph"]),
        ],
        out_specs=(
            pl.BlockSpec((1, L, 1, 1), lambda b: (b, 0, 0, 0)),
            pl.BlockSpec((1, 1, 1), lambda b: (b, 0, 0)),
        ),
        out_shape=(
            jax.ShapeDtypeStruct((B, L, 1, 1), jnp.float32),
            jax.ShapeDtypeStruct((B, 1, 1), jnp.float32),
        ),
        compiler_params=pltpu.CompilerParams(
            dimension_semantics=("parallel",),
            vmem_limit_bytes=32 * 1024 * 1024,
        ),
        cost_estimate=pl.CostEstimate(
            flops=flops, transcendentals=B, bytes_accessed=bytes_accessed),
    )(xcol, xph, kp["w1"], kp["b1"], kp["wenc"], kp["benc"],
      kp["wdec"], kp["bdec"], kp["wph"], kp["bph"])

    return zc4.reshape(B, L), zr3.reshape(B)


# ----------------------------- parameters -----------------------------

def init_params(key, in_channels=3, conv_channels=16, spatial=16, latent_dim=10):
    flatten_features = conv_channels * (spatial // 2) * (spatial // 2)
    ks = jax.random.split(key, 8)

    def winit(k, shape, fan_in):
        return (jax.random.normal(k, shape, jnp.float32) / jnp.sqrt(fan_in)).astype(jnp.float32)

    return dict(
        conv_w=winit(ks[0], (conv_channels, in_channels, 3, 3), in_channels * 9),
        conv_b=winit(ks[1], (conv_channels,), in_channels * 9),
        enc_fc_w=winit(ks[2], (latent_dim, flatten_features), flatten_features),
        enc_fc_b=winit(ks[3], (latent_dim,), flatten_features),
        dec_fc_w=winit(ks[4], (flatten_features, latent_dim), latent_dim),
        dec_fc_b=winit(ks[5], (flatten_features,), latent_dim),
        deconv_w=winit(ks[6], (conv_channels, in_channels, 3, 3), conv_channels * 9),
        deconv_b=winit(ks[7], (in_channels,), conv_channels * 9),
    )


# ----------------------------- pure-JAX reference -----------------------------

def duad_forward_ref(x, params):
    B = x.shape[0]
    x = x.astype(jnp.float32)
    P = lax.Precision.HIGHEST

    h = lax.conv_general_dilated(
        x, params["conv_w"], window_strides=(2, 2), padding=((1, 1), (1, 1)),
        dimension_numbers=("NCHW", "OIHW", "NCHW"), precision=P)
    h = jnp.maximum(h + params["conv_b"][None, :, None, None], 0.0)

    hf = h.reshape(B, -1)
    z_c = jnp.matmul(hf, params["enc_fc_w"].T, precision=P) + params["enc_fc_b"]

    h2 = jnp.maximum(jnp.matmul(z_c, params["dec_fc_w"].T, precision=P)
                     + params["dec_fc_b"], 0.0).reshape(h.shape)

    w_eq = jnp.flip(params["deconv_w"], (2, 3)).transpose(1, 0, 2, 3)   # OIHW
    x_out = lax.conv_general_dilated(
        h2, w_eq, window_strides=(1, 1), padding=((1, 2), (1, 2)),
        lhs_dilation=(2, 2), dimension_numbers=("NCHW", "OIHW", "NCHW"), precision=P)
    x_out = x_out + params["deconv_b"][None, :, None, None]

    xf = x.reshape(B, -1)
    of = x_out.reshape(B, -1)
    dot = jnp.sum(xf * of, axis=1)
    nx = jnp.sqrt(jnp.sum(xf * xf, axis=1))
    ny = jnp.sqrt(jnp.sum(of * of, axis=1))
    z_r = dot / jnp.maximum(nx * ny, 1e-8)
    return z_c, z_r


# ----------------------------- test -----------------------------

if __name__ == "__main__":
    key = jax.random.PRNGKey(0)
    kx, kp = jax.random.split(key)

    B, C, H, W = 2, 3, 16, 16
    latent_dim = 10

    x = jax.random.normal(kx, (B, C, H, W), jnp.float32)
    params = init_params(kp, in_channels=C, conv_channels=16, spatial=H,
                         latent_dim=latent_dim)
    kparams, dims = prepare_kernel_params(params)

    z_c, z_r = duad_forward(x, kparams, dims)
    z_c = jax.block_until_ready(z_c)
    z_r = jax.block_until_ready(z_r)

    z_c_ref, z_r_ref = duad_forward_ref(x, params)

    assert z_c.shape == (B, latent_dim) and z_r.shape == (B,)
    assert jnp.allclose(z_c, z_c_ref, atol=1e-3, rtol=1e-3)
    assert jnp.allclose(z_r, z_r_ref, atol=1e-3, rtol=1e-3)

    print("KERNEL_OK")
</pallas_src>

<mosaic_0001>
module attributes {stable_mosaic.version = 11 : i64} {
  func.func @_duad_kernel(%arg0: i32, %arg1: memref<1x27x64xf32, #tpu.memory_space<vmem>>, %arg2: memref<1x12x64xf32, #tpu.memory_space<vmem>>, %arg3: memref<16x27xf32, #tpu.memory_space<vmem>>, %arg4: memref<16x1xf32, #tpu.memory_space<vmem>>, %arg5: memref<10x16x64xf32, #tpu.memory_space<vmem>>, %arg6: memref<10x1x1xf32, #tpu.memory_space<vmem>>, %arg7: memref<10x64x64xf32, #tpu.memory_space<vmem>>, %arg8: memref<64x64xf32, #tpu.memory_space<vmem>>, %arg9: memref<12x64xf32, #tpu.memory_space<vmem>>, %arg10: memref<12x1xf32, #tpu.memory_space<vmem>>, %arg11: memref<1x10x1x1xf32, #tpu.memory_space<vmem>>, %arg12: memref<1x1x1xf32, #tpu.memory_space<vmem>>) attributes {dimension_semantics = [#tpu.dimension_semantics<parallel>], iteration_bounds = array<i64: 2>, scalar_prefetch = 0 : i64, scratch_operands = 0 : i64, tpu.core_type = #tpu.core_type<tc>, window_params = [{transform_indices = @transform_0, window_bounds = array<i64: 1, 27, 64>}, {transform_indices = @transform_1, window_bounds = array<i64: 1, 12, 64>}, {pipeline_mode = #tpu.pipeline_mode<synchronous>, transform_indices = @transform_2, window_bounds = array<i64: 16, 27>}, {pipeline_mode = #tpu.pipeline_mode<synchronous>, transform_indices = @transform_3, window_bounds = array<i64: 16, 1>}, {pipeline_mode = #tpu.pipeline_mode<synchronous>, transform_indices = @transform_4, window_bounds = array<i64: 10, 16, 64>}, {pipeline_mode = #tpu.pipeline_mode<synchronous>, transform_indices = @transform_5, window_bounds = array<i64: 10, 1, 1>}, {pipeline_mode = #tpu.pipeline_mode<synchronous>, transform_indices = @transform_6, window_bounds = array<i64: 10, 64, 64>}, {pipeline_mode = #tpu.pipeline_mode<synchronous>, transform_indices = @transform_7, window_bounds = array<i64: 64, 64>}, {pipeline_mode = #tpu.pipeline_mode<synchronous>, transform_indices = @transform_8, window_bounds = array<i64: 12, 64>}, {pipeline_mode = #tpu.pipeline_mode<synchronous>, transform_indices = @transform_9, window_bounds = array<i64: 12, 1>}, {transform_indices = @transform_10, window_bounds = array<i64: 1, 10, 1, 1>}, {transform_indices = @transform_11, window_bounds = array<i64: 1, 1, 1>}]} {
    %c0 = arith.constant 0 : index
    %c0_0 = arith.constant 0 : index
    %c0_1 = arith.constant 0 : index
    %0 = vector.load %arg1[%c0, %c0_0, %c0_1] : memref<1x27x64xf32, #tpu.memory_space<vmem>>, vector<1x27x64xf32>
    %1 = vector.shape_cast %0 : vector<1x27x64xf32> to vector<27x64xf32>
    %c0_2 = arith.constant 0 : index
    %c0_3 = arith.constant 0 : index
    %c0_4 = arith.constant 0 : index
    %2 = vector.load %arg2[%c0_2, %c0_3, %c0_4] : memref<1x12x64xf32, #tpu.memory_space<vmem>>, vector<1x12x64xf32>
    %3 = vector.shape_cast %2 : vector<1x12x64xf32> to vector<12x64xf32>
    %c0_5 = arith.constant 0 : index
    %c0_6 = arith.constant 0 : index
    %4 = vector.load %arg3[%c0_5, %c0_6] : memref<16x27xf32, #tpu.memory_space<vmem>>, vector<16x27xf32>
    %cst = arith.constant dense<0.000000e+00> : vector<16x64xf32>
    %5 = tpu.matmul %4, %1, %cst {dimension_numbers = #tpu.dot_dimension_numbers<[1], [0], [0], [1], [0, 0, 1, 1], [], []>} : vector<16x27xf32>, vector<27x64xf32>, vector<16x64xf32> -> vector<16x64xf32>
    %c0_7 = arith.constant 0 : index
    %c0_8 = arith.constant 0 : index
    %6 = vector.load %arg4[%c0_7, %c0_8] : memref<16x1xf32, #tpu.memory_space<vmem>>, vector<16x1xf32>
    %7 = vector.broadcast %6 : vector<16x1xf32> to vector<16x64xf32>
    %8 = arith.addf %5, %7 : vector<16x64xf32>
    %cst_9 = arith.constant 0.000000e+00 : f32
    %9 = vector.broadcast %cst_9 : f32 to vector<16x64xf32>
    %10 = arith.maximumf %8, %9 : vector<16x64xf32>
    %c0_10 = arith.constant 0 : index
    %c0_11 = arith.constant 0 : index
    %c0_12 = arith.constant 0 : index
    %11 = vector.load %arg5[%c0_10, %c0_11, %c0_12] : memref<10x16x64xf32, #tpu.memory_space<vmem>>, vector<10x16x64xf32>
    %12 = vector.shape_cast %10 : vector<16x64xf32> to vector<1x16x64xf32>
    %13 = vector.broadcast %12 : vector<1x16x64xf32> to vector<10x16x64xf32>
    %14 = arith.mulf %11, %13 : vector<10x16x64xf32>
    %cst_13 = arith.constant dense<0.000000e+00> : vector<10x16xf32>
    %15 = vector.multi_reduction <add>, %14, %cst_13 [2] : vector<10x16x64xf32> to vector<10x16xf32>
    %16 = vector.shape_cast %15 : vector<10x16xf32> to vector<10x16x1xf32>
    %cst_14 = arith.constant dense<0.000000e+00> : vector<10x1xf32>
    %17 = vector.multi_reduction <add>, %16, %cst_14 [1] : vector<10x16x1xf32> to vector<10x1xf32>
    %18 = vector.shape_cast %17 : vector<10x1xf32> to vector<10x1x1xf32>
    %c0_15 = arith.constant 0 : index
    %c0_16 = arith.constant 0 : index
    %c0_17 = arith.constant 0 : index
    %19 = vector.load %arg6[%c0_15, %c0_16, %c0_17] : memref<10x1x1xf32, #tpu.memory_space<vmem>>, vector<10x1x1xf32>
    %20 = arith.addf %18, %19 : vector<10x1x1xf32>
    %c0_18 = arith.constant 0 : index
    %c0_19 = arith.constant 0 : index
    %c0_20 = arith.constant 0 : index
    %c0_21 = arith.constant 0 : index
    %21 = vector.load %arg11[%c0_18, %c0_19, %c0_20, %c0_21] : memref<1x10x1x1xf32, #tpu.memory_space<vmem>>, vector<1x10x1x1xf32>
    %22 = vector.shape_cast %21 : vector<1x10x1x1xf32> to vector<10x1x1xf32>
    %23 = vector.shape_cast %20 : vector<10x1x1xf32> to vector<1x10x1x1xf32>
    tpu.vector_store %arg11[%c0_18, %c0_19, %c0_20, %c0_21], %23 {strides = array<i32>} : memref<1x10x1x1xf32, #tpu.memory_space<vmem>>, vector<1x10x1x1xf32>,
    %c0_22 = arith.constant 0 : index
    %c0_23 = arith.constant 0 : index
    %24 = vector.load %arg8[%c0_22, %c0_23] : memref<64x64xf32, #tpu.memory_space<vmem>>, vector<64x64xf32>
    %c0_24 = arith.constant 0 : index
    %c0_25 = arith.constant 0 : index
    %c0_26 = arith.constant 0 : index
    %25 = vector.load %arg7[%c0_24, %c0_25, %c0_26] : memref<10x64x64xf32, #tpu.memory_space<vmem>>, vector<1x64x64xf32>
    %26 = vector.shape_cast %25 : vector<1x64x64xf32> to vector<64x64xf32>
    %27 = vector.extract_strided_slice %20 {offsets = [0, 0, 0], sizes = [1, 1, 1], strides = [1, 1, 1]} : vector<10x1x1xf32> to vector<1x1x1xf32>
    %28 = vector.extract %27[0, 0, 0] : f32 from vector<1x1x1xf32>
    %29 = vector.broadcast %28 : f32 to vector<64x64xf32>
    %30 = arith.mulf %26, %29 : vector<64x64xf32>
    %31 = arith.addf %24, %30 : vector<64x64xf32>
    %c1 = arith.constant 1 : index
    %c0_27 = arith.constant 0 : index
    %c0_28 = arith.constant 0 : index
    %32 = vector.load %arg7[%c1, %c0_27, %c0_28] : memref<10x64x64xf32, #tpu.memory_space<vmem>>, vector<1x64x64xf32>
    %33 = vector.shape_cast %32 : vector<1x64x64xf32> to vector<64x64xf32>
    %34 = vector.extract_strided_slice %20 {offsets = [1, 0, 0], sizes = [1, 1, 1], strides = [1, 1, 1]} : vector<10x1x1xf32> to vector<1x1x1xf32>
    %35 = vector.extract %34[0, 0, 0] : f32 from vector<1x1x1xf32>
    %36 = vector.broadcast %35 : f32 to vector<64x64xf32>
    %37 = arith.mulf %33, %36 : vector<64x64xf32>
    %38 = arith.addf %31, %37 : vector<64x64xf32>
    %c2 = arith.constant 2 : index
    %c0_29 = arith.constant 0 : index
    %c0_30 = arith.constant 0 : index
    %39 = vector.load %arg7[%c2, %c0_29, %c0_30] : memref<10x64x64xf32, #tpu.memory_space<vmem>>, vector<1x64x64xf32>
    %40 = vector.shape_cast %39 : vector<1x64x64xf32> to vector<64x64xf32>
    %41 = vector.extract_strided_slice %20 {offsets = [2, 0, 0], sizes = [1, 1, 1], strides = [1, 1, 1]} : vector<10x1x1xf32> to vector<1x1x1xf32>
    %42 = vector.extract %41[0, 0, 0] : f32 from vector<1x1x1xf32>
    %43 = vector.broadcast %42 : f32 to vector<64x64xf32>
    %44 = arith.mulf %40, %43 : vector<64x64xf32>
    %45 = arith.addf %38, %44 : vector<64x64xf32>
    %c3 = arith.constant 3 : index
    %c0_31 = arith.constant 0 : index
    %c0_32 = arith.constant 0 : index
    %46 = vector.load %arg7[%c3, %c0_31, %c0_32] : memref<10x64x64xf32, #tpu.memory_space<vmem>>, vector<1x64x64xf32>
    %47 = vector.shape_cast %46 : vector<1x64x64xf32> to vector<64x64xf32>
    %48 = vector.extract_strided_slice %20 {offsets = [3, 0, 0], sizes = [1, 1, 1], strides = [1, 1, 1]} : vector<10x1x1xf32> to vector<1x1x1xf32>
    %49 = vector.extract %48[0, 0, 0] : f32 from vector<1x1x1xf32>
    %50 = vector.broadcast %49 : f32 to vector<64x64xf32>
    %51 = arith.mulf %47, %50 : vector<64x64xf32>
    %52 = arith.addf %45, %51 : vector<64x64xf32>
    %c4 = arith.constant 4 : index
    %c0_33 = arith.constant 0 : index
    %c0_34 = arith.constant 0 : index
    %53 = vector.load %arg7[%c4, %c0_33, %c0_34] : memref<10x64x64xf32, #tpu.memory_space<vmem>>, vector<1x64x64xf32>
    %54 = vector.shape_cast %53 : vector<1x64x64xf32> to vector<64x64xf32>
    %55 = vector.extract_strided_slice %20 {offsets = [4, 0, 0], sizes = [1, 1, 1], strides = [1, 1, 1]} : vector<10x1x1xf32> to vector<1x1x1xf32>
    %56 = vector.extract %55[0, 0, 0] : f32 from vector<1x1x1xf32>
    %57 = vector.broadcast %56 : f32 to vector<64x64xf32>
    %58 = arith.mulf %54, %57 : vector<64x64xf32>
    %59 = arith.addf %52, %58 : vector<64x64xf32>
    %c5 = arith.constant 5 : index
    %c0_35 = arith.constant 0 : index
    %c0_36 = arith.constant 0 : index
    %60 = vector.load %arg7[%c5, %c0_35, %c0_36] : memref<10x64x64xf32, #tpu.memory_space<vmem>>, vector<1x64x64xf32>
    %61 = vector.shape_cast %60 : vector<1x64x64xf32> to vector<64x64xf32>
    %62 = vector.extract_strided_slice %20 {offsets = [5, 0, 0], sizes = [1, 1, 1], strides = [1, 1, 1]} : vector<10x1x1xf32> to vector<1x1x1xf32>
    %63 = vector.extract %62[0, 0, 0] : f32 from vector<1x1x1xf32>
    %64 = vector.broadcast %63 : f32 to vector<64x64xf32>
    %65 = arith.mulf %61, %64 : vector<64x64xf32>
    %66 = arith.addf %59, %65 : vector<64x64xf32>
    %c6 = arith.constant 6 : index
    %c0_37 = arith.constant 0 : index
    %c0_38 = arith.constant 0 : index
    %67 = vector.load %arg7[%c6, %c0_37, %c0_38] : memref<10x64x64xf32, #tpu.memory_space<vmem>>, vector<1x64x64xf32>
    %68 = vector.shape_cast %67 : vector<1x64x64xf32> to vector<64x64xf32>
    %69 = vector.extract_strided_slice %20 {offsets = [6, 0, 0], sizes = [1, 1, 1], strides = [1, 1, 1]} : vector<10x1x1xf32> to vector<1x1x1xf32>
    %70 = vector.extract %69[0, 0, 0] : f32 from vector<1x1x1xf32>
    %71 = vector.broadcast %70 : f32 to vector<64x64xf32>
    %72 = arith.mulf %68, %71 : vector<64x64xf32>
    %73 = arith.addf %66, %72 : vector<64x64xf32>
    %c7 = arith.constant 7 : index
    %c0_39 = arith.constant 0 : index
    %c0_40 = arith.constant 0 : index
    %74 = vector.load %arg7[%c7, %c0_39, %c0_40] : memref<10x64x64xf32, #tpu.memory_space<vmem>>, vector<1x64x64xf32>
    %75 = vector.shape_cast %74 : vector<1x64x64xf32> to vector<64x64xf32>
    %76 = vector.extract_strided_slice %20 {offsets = [7, 0, 0], sizes = [1, 1, 1], strides = [1, 1, 1]} : vector<10x1x1xf32> to vector<1x1x1xf32>
    %77 = vector.extract %76[0, 0, 0] : f32 from vector<1x1x1xf32>
    %78 = vector.broadcast %77 : f32 to vector<64x64xf32>
    %79 = arith.mulf %75, %78 : vector<64x64xf32>
    %80 = arith.addf %73, %79 : vector<64x64xf32>
    %c8 = arith.constant 8 : index
    %c0_41 = arith.constant 0 : index
    %c0_42 = arith.constant 0 : index
    %81 = vector.load %arg7[%c8, %c0_41, %c0_42] : memref<10x64x64xf32, #tpu.memory_space<vmem>>, vector<1x64x64xf32>
    %82 = vector.shape_cast %81 : vector<1x64x64xf32> to vector<64x64xf32>
    %83 = vector.extract_strided_slice %20 {offsets = [8, 0, 0], sizes = [1, 1, 1], strides = [1, 1, 1]} : vector<10x1x1xf32> to vector<1x1x1xf32>
    %84 = vector.extract %83[0, 0, 0] : f32 from vector<1x1x1xf32>
    %85 = vector.broadcast %84 : f32 to vector<64x64xf32>
    %86 = arith.mulf %82, %85 : vector<64x64xf32>
    %87 = arith.addf %80, %86 : vector<64x64xf32>
    %c9 = arith.constant 9 : index
    %c0_43 = arith.constant 0 : index
    %c0_44 = arith.constant 0 : index
    %88 = vector.load %arg7[%c9, %c0_43, %c0_44] : memref<10x64x64xf32, #tpu.memory_space<vmem>>, vector<1x64x64xf32>
    %89 = vector.shape_cast %88 : vector<1x64x64xf32> to vector<64x64xf32>
    %90 = vector.extract_strided_slice %20 {offsets = [9, 0, 0], sizes = [1, 1, 1], strides = [1, 1, 1]} : vector<10x1x1xf32> to vector<1x1x1xf32>
    %91 = vector.extract %90[0, 0, 0] : f32 from vector<1x1x1xf32>
    %92 = vector.broadcast %91 : f32 to vector<64x64xf32>
    %93 = arith.mulf %89, %92 : vector<64x64xf32>
    %94 = arith.addf %87, %93 : vector<64x64xf32>
    %cst_45 = arith.constant 0.000000e+00 : f32
    %95 = vector.broadcast %cst_45 : f32 to vector<64x64xf32>
    %96 = arith.maximumf %94, %95 : vector<64x64xf32>
    %c0_46 = arith.constant 0 : index
    %c0_47 = arith.constant 0 : index
    %97 = vector.load %arg9[%c0_46, %c0_47] : memref<12x64xf32, #tpu.memory_space<vmem>>, vector<12x64xf32>
    %cst_48 = arith.constant dense<0.000000e+00> : vector<12x64xf32>
    %98 = tpu.matmul %97, %96, %cst_48 {dimension_numbers = #tpu.dot_dimension_numbers<[1], [0], [0], [1], [0, 0, 1, 1], [], []>} : vector<12x64xf32>, vector<64x64xf32>, vector<12x64xf32> -> vector<12x64xf32>
    %c0_49 = arith.constant 0 : index
    %c0_50 = arith.constant 0 : index
    %99 = vector.load %arg10[%c0_49, %c0_50] : memref<12x1xf32, #tpu.memory_space<vmem>>, vector<12x1xf32>
    %100 = vector.broadcast %99 : vector<12x1xf32> to vector<12x64xf32>
    %101 = arith.addf %98, %100 : vector<12x64xf32>
    %102 = arith.mulf %3, %101 : vector<12x64xf32>
    %103 = vector.shape_cast %102 : vector<12x64xf32> to vector<1x12x64xf32>
    %cst_51 = arith.constant dense<0.000000e+00> : vector<1xf32>
    %104 = vector.multi_reduction <add>, %103, %cst_51 [1, 2] : vector<1x12x64xf32> to vector<1xf32>
    %105 = vector.shape_cast %104 : vector<1xf32> to vector<1x1x1xf32>
    %106 = vector.extract %105[0, 0, 0] : f32 from vector<1x1x1xf32>
    %107 = arith.mulf %3, %3 : vector<12x64xf32>
    %108 = vector.shape_cast %107 : vector<12x64xf32> to vector<1x12x64xf32>
    %cst_52 = arith.constant dense<0.000000e+00> : vector<1xf32>
    %109 = vector.multi_reduction <add>, %108, %cst_52 [1, 2] : vector<1x12x64xf32> to vector<1xf32>
    %110 = vector.shape_cast %109 : vector<1xf32> to vector<1x1x1xf32>
    %111 = vector.extract %110[0, 0, 0] : f32 from vector<1x1x1xf32>
    %112 = arith.mulf %101, %101 : vector<12x64xf32>
    %113 = vector.shape_cast %112 : vector<12x64xf32> to vector<1x12x64xf32>
    %cst_53 = arith.constant dense<0.000000e+00> : vector<1xf32>
    %114 = vector.multi_reduction <add>, %113, %cst_53 [1, 2] : vector<1x12x64xf32> to vector<1xf32>
    %115 = vector.shape_cast %114 : vector<1xf32> to vector<1x1x1xf32>
    %116 = vector.extract %115[0, 0, 0] : f32 from vector<1x1x1xf32>
    %117 = arith.mulf %111, %116 : f32
    %cst_54 = arith.constant 9.99999993E-9 : f32
    %cst_55 = arith.constant 9.99999993E-9 : f32
    %118 = arith.mulf %cst_54, %cst_55 : f32
    %119 = arith.maximumf %117, %118 : f32
    %120 = math.rsqrt %119 : f32
    %121 = arith.mulf %106, %120 : f32
    %122 = vector.broadcast %121 : f32 to vector<1x1x1xf32>
    %c0_56 = arith.constant 0 : index
    %c0_57 = arith.constant 0 : index
    %c0_58 = arith.constant 0 : index
    %123 = vector.load %arg12[%c0_56, %c0_57, %c0_58] : memref<1x1x1xf32, #tpu.memory_space<vmem>>, vector<1x1x1xf32>
    tpu.vector_store %arg12[%c0_56, %c0_57, %c0_58], %122 {strides = array<i32>} : memref<1x1x1xf32, #tpu.memory_space<vmem>>, vector<1x1x1xf32>,
    return
  }
  func.func @transform_0(%arg0: i32) -> (i32, i32, i32) {
    %c0_i32 = arith.constant 0 : i32
    %c0_i32_0 = arith.constant 0 : i32
    %c0_i32_1 = arith.constant 0 : i32
    return %arg0, %c0_i32, %c0_i32_0 : i32, i32, i32
  }
  func.func @transform_1(%arg0: i32) -> (i32, i32, i32) {
    %c0_i32 = arith.constant 0 : i32
    %c0_i32_0 = arith.constant 0 : i32
    %c0_i32_1 = arith.constant 0 : i32
    return %arg0, %c0_i32, %c0_i32_0 : i32, i32, i32
  }
  func.func @transform_2(%arg0: i32) -> (i32, i32) {
    %c0_i32 = arith.constant 0 : i32
    %c0_i32_0 = arith.constant 0 : i32
    %c0_i32_1 = arith.constant 0 : i32
    return %c0_i32, %c0_i32_0 : i32, i32
  }
  func.func @transform_3(%arg0: i32) -> (i32, i32) {
    %c0_i32 = arith.constant 0 : i32
    %c0_i32_0 = arith.constant 0 : i32
    %c0_i32_1 = arith.constant 0 : i32
    return %c0_i32, %c0_i32_0 : i32, i32
  }
  func.func @transform_4(%arg0: i32) -> (i32, i32, i32) {
    %c0_i32 = arith.constant 0 : i32
    %c0_i32_0 = arith.constant 0 : i32
    %c0_i32_1 = arith.constant 0 : i32
    %c0_i32_2 = arith.constant 0 : i32
    return %c0_i32, %c0_i32_0, %c0_i32_1 : i32, i32, i32
  }
  func.func @transform_5(%arg0: i32) -> (i32, i32, i32) {
    %c0_i32 = arith.constant 0 : i32
    %c0_i32_0 = arith.constant 0 : i32
    %c0_i32_1 = arith.constant 0 : i32
    %c0_i32_2 = arith.constant 0 : i32
    return %c0_i32, %c0_i32_0, %c0_i32_1 : i32, i32, i32
  }
  func.func @transform_6(%arg0: i32) -> (i32, i32, i32) {
    %c0_i32 = arith.constant 0 : i32
    %c0_i32_0 = arith.constant 0 : i32
    %c0_i32_1 = arith.constant 0 : i32
    %c0_i32_2 = arith.constant 0 : i32
    return %c0_i32, %c0_i32_0, %c0_i32_1 : i32, i32, i32
  }
  func.func @transform_7(%arg0: i32) -> (i32, i32) {
    %c0_i32 = arith.constant 0 : i32
    %c0_i32_0 = arith.constant 0 : i32
    %c0_i32_1 = arith.constant 0 : i32
    return %c0_i32, %c0_i32_0 : i32, i32
  }
  func.func @transform_8(%arg0: i32) -> (i32, i32) {
    %c0_i32 = arith.constant 0 : i32
    %c0_i32_0 = arith.constant 0 : i32
    %c0_i32_1 = arith.constant 0 : i32
    return %c0_i32, %c0_i32_0 : i32, i32
  }
  func.func @transform_9(%arg0: i32) -> (i32, i32) {
    %c0_i32 = arith.constant 0 : i32
    %c0_i32_0 = arith.constant 0 : i32
    %c0_i32_1 = arith.constant 0 : i32
    return %c0_i32, %c0_i32_0 : i32, i32
  }
  func.func @transform_10(%arg0: i32) -> (i32, i32, i32, i32) {
    %c0_i32 = arith.constant 0 : i32
    %c0_i32_0 = arith.constant 0 : i32
    %c0_i32_1 = arith.constant 0 : i32
    %c0_i32_2 = arith.constant 0 : i32
    return %arg0, %c0_i32, %c0_i32_0, %c0_i32_1 : i32, i32, i32, i32
  }
  func.func @transform_11(%arg0: i32) -> (i32, i32, i32) {
    %c0_i32 = arith.constant 0 : i32
    %c0_i32_0 = arith.constant 0 : i32
    %c0_i32_1 = arith.constant 0 : i32
    return %arg0, %c0_i32, %c0_i32_0 : i32, i32, i32
  }
}

</mosaic_0001>

<bundles_post_ra>
// kernel: duad_forward.1
= control target key start
LH: loop header
LB: loop body
LE: loop exit
PB: predicated region body
PF: predicated region fallthrough
CT: control target
= control target key end

     0   :  { %s1494_s17 = smov 0   ;;  %s2060_s0 = inlined_call_operand.vmem [shape: f32[2,27,64], index: 0, kind: input, shape index: {}]   ;;  %s2061_s1 = inlined_call_operand.vmem [shape: f32[2,12,64], index: 1, kind: input, shape index: {}]   ;;  %s2062_s2 = inlined_call_operand.vmem [shape: f32[16,27], index: 2, kind: input, shape index: {}]   ;;  %s2063_s3 = inlined_call_operand.vmem [shape: f32[16,1], index: 3, kind: input, shape index: {}]   ;;  %s2064_s4 = inlined_call_operand.vmem [shape: f32[10,16,64], index: 4, kind: input, shape index: {}]   ;;  %s2065_s5 = inlined_call_operand.vmem [shape: f32[10,1,1], index: 5, kind: input, shape index: {}]   ;;  %s2066_s6 = inlined_call_operand.vmem [shape: f32[10,64,64], index: 6, kind: input, shape index: {}]   ;;  %s2067_s7 = inlined_call_operand.vmem [shape: f32[64,64], index: 7, kind: input, shape index: {}]   ;;  %s2068_s8 = inlined_call_operand.vmem [shape: f32[12,64], index: 8, kind: input, shape index: {}]   ;;  %s2069_s9 = inlined_call_operand.vmem [shape: f32[12,1], index: 9, kind: input, shape index: {}]   ;;  %s2070_s10 = inlined_call_operand.vmem [shape: f32[2,10,1,1], index: 10, kind: output, shape index: {0}]   ;;  %s2071_s11 = inlined_call_operand.vmem [shape: f32[2,1,1], index: 11, kind: output, shape index: {1}]  }
   0x1 LB: > { %s1245_s18 = sadd.s32 4294967295, %s1430_s17   ;;  %p1249_p0 = scmp.ge.s32.totalorder %s1430_s17, 1  ;;  %s1430_s17 = sphi %s1494_s17, %s22_s17  }
   0x2   : > { %p350_p1 = scmp.lt.s32.totalorder %s1430_s17, 3 }
   0x4   : > { %p351_p2 = pnand %p1249_p0, %p350_p1 }
   0x5   : > { %p397_p3 = scmp.lt.s32.totalorder (!%p351_p2), %s1245_s18, 1 }
   0x6   : > { %354 = sbr.rel (%p351_p2) target bundleno = 983 (0x3d7), region = 60 }
   0xb   : > { %v420_v0 = vld [vmem:[%s2062_s2] sm:$0xff]  ;;  %vm434_vm0 = vcmask 220160   ;;  %v1432_v1 = vmov 0   ;;  %s2073_s18 = smov (!%p397_p3, %s1245_s18), 1  ;;  %v423_v3 = vld [vmem:[%s2063_s3 + $0x8] sm:$0xff]  ;;  %vm441_vm1 = vcmask 1042432  }
   0xc   : > { %1359 = vmatprep.mubr.msk.f32.mxu0 %vm434_vm0, %v420_v0  ;;  %1420 = vset.pattern.permute.xlu0 %v1432_v1  ;;  %v422_v2 = vld [vmem:[%s2063_s3] sm:$0xff]  ;;  %s1333_s25 = sshll.u32 %s2073_s18, 5  ;;  %v421_v8 = vld [vmem:[%s2062_s2 + $0x8] sm:$0xff]  ;;  %v533_v14 = vld [vmem:[%s2064_s4 + $0x58] sm:$0xff]  ;;  %vm562_vm2 = vcmask 523264   ;;  %s1381_s22 = smul.u32 10, %s2073_s18 }
   0xd   : > { %426 = vperm.xlu0 %1420, %v422_v2   ;;  %1421 = vset.pattern.permute.xlu1 %v1432_v1  ;;  %s401_s28 = scalar_lea.vmem %s2060_s0, %s1333_s25  ;;  %v523_v15 = vld [vmem:[%s2064_s4 + $0x8] sm:$0xff]  ;;  %v525_v18 = vld [vmem:[%s2064_s4 + $0x18] sm:$0xff]  ;;  %v524_v19 = vld [vmem:[%s2064_s4 + $0x10] sm:$0xff]  ;;  %vm713_vm3 = vcmask 0   ;;  %s1334_s19 = sshll.u32 %s2073_s18, 4  ;;  %vm1107_vm4 = vcmask 519168  }
   0xe   : > { %v417_v4 = vld [vmem:[%s401_s28 + $0x18] sm:$0x7]  ;;  %v416_v5 = vld [vmem:[%s401_s28 + $0x10] sm:$0xff]  ;;  %v415_v6 = vld [vmem:[%s401_s28 + $0x8] sm:$0xff]  ;;  %s1624_s27 = scalar_lea.vmem %s2070_s10, %s1381_s22  ;;  %s406_s23 = scalar_lea.vmem %s2061_s1, %s1334_s19 }
   0xf   : > { %1351 = vmatprep.subr.msk.mxu0 %vm441_vm1, %v417_v4  ;;  %v414_v7 = vld [vmem:[%s401_s28] sm:$0xff]  ;;  %v527_v27 = vld [vmem:[%s2064_s4 + $0x28] sm:$0xff]  ;;  %v529_v33 = vld [vmem:[%s2064_s4 + $0x38] sm:$0xff]  ;;  %s413_s12 = scalar_lea.vmem %s2071_s11, %s2073_s18 }
  0x10   : > { %1352 = vmatpush3.msk.msra.mxu0 %vm441_vm1, %v417_v4  ;;  %v535_v28 = vld [vmem:[%s2064_s4 + $0x68] sm:$0xff]  ;;  %v537_v34 = vld [vmem:[%s2064_s4 + $0x78] sm:$0xff]  ;;  %v522_v46 = vld [vmem:[%s2064_s4] sm:$0xff] }
  0x11   : > { %431 = vperm.xlu0 %1420, %v423_v3   ;;  %1353 = vmatprep.subr.mxu0 %v416_v5  ;;  %v531_v39 = vld [vmem:[%s2064_s4 + $0x48] sm:$0xff]  ;;  %v541_v45 = vld [vmem:[%s2064_s4 + $0x98] sm:$0xff]  ;;  %v526_v51 = vld [vmem:[%s2064_s4 + $0x20] sm:$0xff] }
  0x12   : > { %1354 = vmatpush3.msra.mxu0 %v416_v5  ;;  %v539_v40 = vld [vmem:[%s2064_s4 + $0x88] sm:$0xff]  ;;  %v528_v55 = vld [vmem:[%s2064_s4 + $0x30] sm:$0xff]  ;;  %v530_v58 = vld [vmem:[%s2064_s4 + $0x40] sm:$0xff] }
  0x13   : > { %1355 = vmatprep.subr.mxu0 %v415_v6  ;;  %v532_v61 = vld [vmem:[%s2064_s4 + $0x50] sm:$0xff]  ;;  %v534_v0 = vld [vmem:[%s2064_s4 + $0x60] sm:$0xff]  ;;  %v1012_v5 = vld [vmem:[%s2069_s9 + $0x8] sm:$0xf] }
  0x14   : > { %1356 = vmatpush3.msra.mxu0 %v415_v6  ;;  %v536_v3 = vld [vmem:[%s2064_s4 + $0x70] sm:$0xff] }
  0x15   : > { %1357 = vmatprep.subr.mxu0 %v414_v7 }
  0x16   : > { %1358 = vmatpush3.msra.mxu0 %v414_v7  ;;  %v538_v7 = vld [vmem:[%s2064_s4 + $0x80] sm:$0xff] }
  0x17   : > { %1360 = vmatmul.mubr.msk.f32.vlgmr.msra.gmra.mxu0 %vm434_vm0, %v421_v8 }
  0x88   : > { %v427_v9 = vpop.permute.xlu0 %426 }
  0x8c   : > { %v432_v10 = vpop.permute.xlu0 %431 }
  0xd7   : > { %v1361_v11 = vpop.f32.mrf.mxu0 }
  0xd8   : > { %v517_v12 = vadd.f32 %v1361_v11, %v432_v10  ;;  %v540_v10 = vld [vmem:[%s2064_s4 + $0x90] sm:$0xff] }
  0xd9   : > { %v511_v13 = vpop.f32.mrf.mxu0 }
  0xda   : > { %v521_v16 = vmax.f32 %v517_v12, 0.0  ;;  %v512_v17 = vadd.f32 %v511_v13, %v427_v9 }
  0xdc   : > { %v1534_v20 = vmax.f32 %v512_v17, 0.0  ;;  %v553_v21 = vmul.f32 %v533_v14, %v521_v16  ;;  %v543_v22 = vmul.f32 %v523_v15, %v521_v16  ;;  %v545_v25 = vmul.f32 %v525_v18, %v521_v16 }
  0xdd   : > { %v547_v31 = vmul.f32 %v527_v27, %v521_v16  ;;  %v555_v32 = vmul.f32 %v535_v28, %v521_v16  ;;  %v549_v37 = vmul.f32 %v529_v33, %v521_v16  ;;  %v557_v38 = vmul.f32 %v537_v34, %v521_v16 }
  0xde   : > { %v596_v23 = vsel %vm562_vm2, %v553_v21, 0.0  ;;  %v566_v24 = vsel %vm562_vm2, %v543_v22, 0.0  ;;  %v544_v26 = vmul.f32 %v524_v19, %v1534_v20  ;;  %v572_v29 = vsel %vm562_vm2, %v545_v25, 0.0 }
  0xdf   : > { %597 = vadd.xlane.f32.xlu0 %v596_v23  ;;  %567 = vadd.xlane.f32.xlu1 %v566_v24  ;;  %v578_v35 = vsel %vm562_vm2, %v547_v31, 0.0  ;;  %v602_v36 = vsel %vm562_vm2, %v555_v32, 0.0  ;;  %v584_v41 = vsel %vm562_vm2, %v549_v37, 0.0  ;;  %v608_v42 = vsel %vm562_vm2, %v557_v38, 0.0  ;;  %v1011_v31 = vld [vmem:[%s2069_s9] sm:$0xff] }
  0xe0   : > { %v569_v30 = vsel %vm562_vm2, %v544_v26, 0.0  ;;  %v551_v43 = vmul.f32 %v531_v39, %v521_v16  ;;  %v559_v44 = vmul.f32 %v539_v40, %v521_v16  ;;  %v561_v49 = vmul.f32 %v541_v45, %v521_v16 }
  0xe1   : > { %v542_v50 = vmul.f32 %v522_v46, %v1534_v20  ;;  %v546_v54 = vmul.f32 %v526_v51, %v1534_v20  ;;  %v548_v57 = vmul.f32 %v528_v55, %v1534_v20  ;;  %v550_v60 = vmul.f32 %v530_v58, %v1534_v20 }
  0xe2   : > { %v590_v47 = vsel %vm562_vm2, %v551_v43, 0.0  ;;  %v614_v48 = vsel %vm562_vm2, %v559_v44, 0.0  ;;  %v620_v52 = vsel %vm562_vm2, %v561_v49, 0.0  ;;  %v552_v63 = vmul.f32 %v532_v61, %v1534_v20 }
  0xe3   : > { %573 = vadd.xlane.f32.xlu1 %v572_v29  ;;  %570 = vadd.xlane.f32.xlu0 %v569_v30  ;;  %v563_v53 = vsel %vm562_vm2, %v542_v50, 0.0  ;;  %v575_v56 = vsel %vm562_vm2, %v546_v54, 0.0  ;;  %v581_v59 = vsel %vm562_vm2, %v548_v57, 0.0  ;;  %v587_v62 = vsel %vm562_vm2, %v550_v60, 0.0  ;;  %v1009_v29 = vld [vmem:[%s2068_s8] sm:$0xff] }
  0xe4   : > { %v593_v1 = vsel %vm562_vm2, %v552_v63, 0.0  ;;  %v554_v2 = vmul.f32 %v534_v0, %v1534_v20  ;;  %v556_v6 = vmul.f32 %v536_v3, %v1534_v20  ;;  %v558_v9 = vmul.f32 %v538_v7, %v1534_v20  ;;  %1378 = vmatprep.mubr.msk.f32.mxu1 %vm562_vm2, %v1009_v29 }
  0xe5   : > { %v560_v12 = vmul.f32 %v540_v10, %v1534_v20  ;;  %v694_v20 = vld [vmem:[%s2065_s5 + $0x1] sm:$0x1] }
  0xe6   : > { %v599_v4 = vsel %vm562_vm2, %v554_v2, 0.0  ;;  %v605_v8 = vsel %vm562_vm2, %v556_v6, 0.0  ;;  %v611_v11 = vsel %vm562_vm2, %v558_v9, 0.0  ;;  %v696_v6 = vld [vmem:[%s2065_s5 + $0x3] sm:$0x1] }
  0xe7   : > { %579 = vadd.xlane.f32.xlu1 %v578_v35  ;;  %603 = vadd.xlane.f32.xlu0 %v602_v36  ;;  %v617_v13 = vsel %vm562_vm2, %v560_v12, 0.0 }
  0xeb   : > { %585 = vadd.xlane.f32.xlu1 %v584_v41  ;;  %609 = vadd.xlane.f32.xlu0 %v608_v42 }
  0xef   : > { %591 = vadd.xlane.f32.xlu1 %v590_v47  ;;  %615 = vadd.xlane.f32.xlu0 %v614_v48  ;;  %v693_v48 = vld [vmem:[%s2065_s5] sm:$0x1] }
  0xf3   : > { %621 = vadd.xlane.f32.xlu0 %v620_v52  ;;  %564 = vadd.xlane.f32.xlu1 %v563_v53 }
  0xf7   : > { %576 = vadd.xlane.f32.xlu1 %v575_v56 }
  0xfb   : > { %582 = vadd.xlane.f32.xlu1 %v581_v59  ;;  %v695_v59 = vld [vmem:[%s2065_s5 + $0x2] sm:$0x1] }
  0xff   : > { %588 = vadd.xlane.f32.xlu1 %v587_v62 }
 0x103   : > { %594 = vadd.xlane.f32.xlu1 %v593_v1 }
 0x107   : > { %600 = vadd.xlane.f32.xlu1 %v599_v4 }
 0x109   : > { %1020 = vperm.xlu0 %1420, %v1012_v5  }
 0x10b   : > { %606 = vadd.xlane.f32.xlu1 %v605_v8 }
 0x10f   : > { %612 = vadd.xlane.f32.xlu1 %v611_v11 }
 0x113   : > { %618 = vadd.xlane.f32.xlu1 %v617_v13 }
 0x124   : > { %1015 = vperm.xlu1 %1421, %v1011_v31  }
 0x168   : > { %v598_v14 = vpop.xlane.xlu0 %597  ;;  %v568_v15 = vpop.xlane.xlu1 %567 }
 0x16c   : > { %v574_v16 = vpop.xlane.xlu1 %573  ;;  %v571_v17 = vpop.xlane.xlu0 %570 }
 0x16d   : > { %v630_v18 = vadd.f32 %v574_v16, %v571_v17  ;;  %v697_v16 = vld [vmem:[%s2065_s5 + $0x4] sm:$0x1] }
 0x16f   : > { %v631_v19 = vrot.slane %v630_v18, 4 }
 0x170   : > { %v580_v21 = vpop.xlane.xlu1 %579  ;;  %v604_v53 = vpop.xlane.xlu0 %603 }
 0x171   : > { %v632_v22 = vadd.f32 %v631_v19, %v630_v18 }
 0x173   : > { %v633_v23 = vrot.slane %v632_v22, 2 }
 0x174   : > { %v586_v24 = vpop.xlane.xlu1 %585  ;;  %v610_v4 = vpop.xlane.xlu0 %609 }
 0x175   : > { %v634_v25 = vadd.f32 %v633_v23, %v632_v22 }
 0x177   : > { %v635_v26 = vrot.slane %v634_v25, 1 }
 0x178   : > { %v592_v27 = vpop.xlane.xlu1 %591  ;;  %v616_v22 = vpop.xlane.xlu0 %615 }
 0x179   : > { %v636_v28 = vadd.f32 %v635_v26, %v634_v25 }
 0x17b   : > { %v704_v30 = vadd.f32 %v694_v20, %v636_v28  ;;  %v698_v20 = vld [vmem:[%s2065_s5 + $0x5] sm:$0x1] }
 0x17c   : > { %v565_v32 = vpop.xlane.xlu1 %564 }
 0x17d   : > { %v623_v33 = vadd.f32 %v568_v15, %v565_v32  ;;  %715 = vst.msk [vmem:[%s1624_s27 + $0x1] sm:$0x1] %vm713_vm3, %v704_v30 }
 0x17f   : > { %v624_v34 = vrot.slane %v623_v33, 4 }
 0x180   : > { %v577_v35 = vpop.xlane.xlu1 %576 }
 0x181   : > { %v625_v36 = vadd.f32 %v624_v34, %v623_v33  ;;  %v637_v37 = vadd.f32 %v580_v21, %v577_v35 }
 0x183   : > { %v626_v38 = vrot.slane %v625_v36, 2  ;;  %v638_v39 = vrot.slane %v637_v37, 4 }
 0x184   : > { %v583_v40 = vpop.xlane.xlu1 %582 }
 0x185   : > { %v627_v41 = vadd.f32 %v626_v38, %v625_v36  ;;  %v639_v42 = vadd.f32 %v638_v39, %v637_v37  ;;  %v644_v43 = vadd.f32 %v586_v24, %v583_v40  ;;  %v622_v36 = vpop.xlane.xlu0 %621  ;;  %v699_v38 = vld [vmem:[%s2065_s5 + $0x6] sm:$0x1] }
 0x187   : > { %v640_v44 = vrot.slane %v639_v42, 2  ;;  %v645_v45 = vrot.slane %v644_v43, 4  ;;  %v628_v46 = vrot.slane %v627_v41, 1 }
 0x188   : > { %v589_v47 = vpop.xlane.xlu1 %588 }
 0x189   : > { %v641_v49 = vadd.f32 %v640_v44, %v639_v42  ;;  %v646_v50 = vadd.f32 %v645_v45, %v644_v43  ;;  %v651_v51 = vadd.f32 %v592_v27, %v589_v47  ;;  %v629_v52 = vadd.f32 %v628_v46, %v627_v41  ;;  %v700_v47 = vld [vmem:[%s2065_s5 + $0x7] sm:$0x1] }
 0x18b   : > { %v647_v54 = vrot.slane %v646_v50, 2  ;;  %v652_v55 = vrot.slane %v651_v51, 4  ;;  %v703_v56 = vadd.f32 %v693_v48, %v629_v52  ;;  %v642_v57 = vrot.slane %v641_v49, 1 }
 0x18c   : > { %v595_v58 = vpop.xlane.xlu1 %594 }
 0x18d   : > { %v648_v60 = vadd.f32 %v647_v54, %v646_v50  ;;  %v653_v61 = vadd.f32 %v652_v55, %v651_v51  ;;  %v658_v62 = vadd.f32 %v598_v14, %v595_v58  ;;  %714 = vst.msk [vmem:[%s1624_s27] sm:$0x1] %vm713_vm3, %v703_v56  ;;  %v643_v63 = vadd.f32 %v642_v57, %v641_v49  ;;  %v701_v54 = vld [vmem:[%s2065_s5 + $0x8] sm:$0x1] }
 0x18e   : > { %1382 = vpush %v703_v56 }
 0x18f   : > { %1384 = vpush %v704_v30  ;;  %v654_v0 = vrot.slane %v653_v61, 2  ;;  %v659_v1 = vrot.slane %v658_v62, 4  ;;  %v705_v2 = vadd.f32 %v695_v59, %v643_v63  ;;  %v649_v3 = vrot.slane %v648_v60, 1  ;;  %v702_v59 = vld [vmem:[%s2065_s5 + $0x9] sm:$0x1] }
 0x190   : > { %v601_v5 = vpop.xlane.xlu1 %600  ;;  %v733_v63 = vld [vmem:[%s2066_s6 + $0x8] sm:$0xff] }
 0x191   : > { %v655_v7 = vadd.f32 %v654_v0, %v653_v61  ;;  %v660_v8 = vadd.f32 %v659_v1, %v658_v62  ;;  %v665_v9 = vadd.f32 %v604_v53, %v601_v5  ;;  %716 = vst.msk [vmem:[%s1624_s27 + $0x2] sm:$0x1] %vm713_vm3, %v705_v2  ;;  %v650_v10 = vadd.f32 %v649_v3, %v648_v60  ;;  %v732_v62 = vld [vmem:[%s2066_s6] sm:$0xff]  ;;  %v734_v0 = vld [vmem:[%s2066_s6 + $0x10] sm:$0xff]  ;;  %v735_v1 = vld [vmem:[%s2066_s6 + $0x18] sm:$0xff] }
 0x192   : > { %1386 = vpush %v705_v2  ;;  %v736_v2 = vld [vmem:[%s2066_s6 + $0x20] sm:$0xff]  ;;  %v737_v3 = vld [vmem:[%s2066_s6 + $0x28] sm:$0xff] }
 0x193   : > { %v661_v11 = vrot.slane %v660_v8, 2  ;;  %v666_v12 = vrot.slane %v665_v9, 4  ;;  %v706_v13 = vadd.f32 %v696_v6, %v650_v10  ;;  %v656_v14 = vrot.slane %v655_v7, 1  ;;  %v739_v6 = vld [vmem:[%s2066_s6 + $0x38] sm:$0xff] }
 0x194   : > { %v607_v15 = vpop.xlane.xlu1 %606 }
 0x195   : > { %v662_v17 = vadd.f32 %v661_v11, %v660_v8  ;;  %v667_v18 = vadd.f32 %v666_v12, %v665_v9  ;;  %v672_v19 = vadd.f32 %v610_v4, %v607_v15  ;;  %717 = vst.msk [vmem:[%s1624_s27 + $0x3] sm:$0x1] %vm713_vm3, %v706_v13  ;;  %v657_v21 = vadd.f32 %v656_v14, %v655_v7  ;;  %v738_v4 = vld [vmem:[%s2066_s6 + $0x30] sm:$0xff]  ;;  %v724_v7 = vld [vmem:[%s2067_s7] sm:$0xff]  ;;  %v725_v8 = vld [vmem:[%s2067_s7 + $0x8] sm:$0xff] }
 0x196   : > { %1388 = vpush %v706_v13  ;;  %v726_v12 = vld [vmem:[%s2067_s7 + $0x10] sm:$0xff]  ;;  %v727_v13 = vld [vmem:[%s2067_s7 + $0x18] sm:$0xff]  ;;  %v728_v14 = vld [vmem:[%s2067_s7 + $0x20] sm:$0xff] }
 0x197   : > { %v668_v23 = vrot.slane %v667_v18, 2  ;;  %v673_v24 = vrot.slane %v672_v19, 4  ;;  %v707_v25 = vadd.f32 %v697_v16, %v657_v21  ;;  %v663_v26 = vrot.slane %v662_v17, 1  ;;  %v730_v21 = vld [vmem:[%s2067_s7 + $0x30] sm:$0xff] }
 0x198   : > { %v613_v27 = vpop.xlane.xlu1 %612 }
 0x199   : > { %v669_v28 = vadd.f32 %v668_v23, %v667_v18  ;;  %v674_v29 = vadd.f32 %v673_v24, %v672_v19  ;;  %v679_v30 = vadd.f32 %v616_v22, %v613_v27  ;;  %718 = vst.msk [vmem:[%s1624_s27 + $0x4] sm:$0x1] %vm713_vm3, %v707_v25  ;;  %v664_v31 = vadd.f32 %v663_v26, %v662_v17  ;;  %v729_v19 = vld [vmem:[%s2067_s7 + $0x28] sm:$0xff]  ;;  %v731_v22 = vld [vmem:[%s2067_s7 + $0x38] sm:$0xff]  ;;  %v1257_v24 = vld [vmem:[%s2066_s6 + $0x40] sm:$0xff] }
 0x19a   : > { %1390 = vpush %v707_v25  ;;  %v1258_v25 = vld [vmem:[%s2066_s6 + $0x48] sm:$0xff]  ;;  %v1259_v26 = vld [vmem:[%s2066_s6 + $0x50] sm:$0xff] }
 0x19b   : > { %v675_v32 = vrot.slane %v674_v29, 2  ;;  %v680_v33 = vrot.slane %v679_v30, 4  ;;  %v708_v34 = vadd.f32 %v698_v20, %v664_v31  ;;  %v670_v35 = vrot.slane %v669_v28, 1  ;;  %v1261_v31 = vld [vmem:[%s2066_s6 + $0x60] sm:$0xff] }
 0x19c   : > { %v619_v37 = vpop.xlane.xlu1 %618 }
 0x19d   : > { %v676_v39 = vadd.f32 %v675_v32, %v674_v29  ;;  %v681_v40 = vadd.f32 %v680_v33, %v679_v30  ;;  %v686_v41 = vadd.f32 %v622_v36, %v619_v37  ;;  %719 = vst.msk [vmem:[%s1624_s27 + $0x5] sm:$0x1] %vm713_vm3, %v708_v34  ;;  %v671_v42 = vadd.f32 %v670_v35, %v669_v28  ;;  %v1260_v30 = vld [vmem:[%s2066_s6 + $0x58] sm:$0xff]  ;;  %v1262_v32 = vld [vmem:[%s2066_s6 + $0x68] sm:$0xff]  ;;  %v1263_v37 = vld [vmem:[%s2066_s6 + $0x70] sm:$0xff] }
 0x19e   : > { %1392 = vpush %v708_v34 }
 0x19f   : > { %v682_v43 = vrot.slane %v681_v40, 2  ;;  %v687_v44 = vrot.slane %v686_v41, 4  ;;  %v709_v45 = vadd.f32 %v699_v38, %v671_v42  ;;  %v677_v46 = vrot.slane %v676_v39, 1  ;;  %v1264_v38 = vld [vmem:[%s2066_s6 + $0x78] sm:$0xff] }
 0x1a1   : > { %v683_v48 = vadd.f32 %v682_v43, %v681_v40  ;;  %v688_v49 = vadd.f32 %v687_v44, %v686_v41  ;;  %720 = vst.msk [vmem:[%s1624_s27 + $0x6] sm:$0x1] %vm713_vm3, %v709_v45  ;;  %v678_v50 = vadd.f32 %v677_v46, %v676_v39 }
 0x1a2   : > { %1394 = vpush %v709_v45 }
 0x1a3   : > { %v689_v51 = vrot.slane %v688_v49, 2  ;;  %v710_v52 = vadd.f32 %v700_v47, %v678_v50  ;;  %v684_v53 = vrot.slane %v683_v48, 1  ;;  %v1265_v47 = vld [vmem:[%s2066_s6 + $0x80] sm:$0xff] }
 0x1a5   : > { %v690_v55 = vadd.f32 %v689_v51, %v688_v49  ;;  %721 = vst.msk [vmem:[%s1624_s27 + $0x7] sm:$0x1] %vm713_vm3, %v710_v52  ;;  %v685_v56 = vadd.f32 %v684_v53, %v683_v48  ;;  %v1266_v48 = vld [vmem:[%s2066_s6 + $0x88] sm:$0xff]  ;;  %v1271_v49 = vld [vmem:[%s2066_s6 + $0xb0] sm:$0xff] }
 0x1a6   : > { %1396 = vpush %v710_v52 }
 0x1a7   : > { %v711_v57 = vadd.f32 %v701_v54, %v685_v56  ;;  %v691_v58 = vrot.slane %v690_v55, 1  ;;  %v1267_v54 = vld [vmem:[%s2066_s6 + $0x90] sm:$0xff]  ;;  %v1270_v56 = vld [vmem:[%s2066_s6 + $0xa8] sm:$0xff] }
 0x1a9   : > { %722 = vst.msk [vmem:[%s1624_s27 + $0x8] sm:$0x1] %vm713_vm3, %v711_v57  ;;  %v692_v60 = vadd.f32 %v691_v58, %v690_v55  ;;  %v1268_v55 = vld [vmem:[%s2066_s6 + $0x98] sm:$0xff] }
 0x1aa   : > { %1398 = vpush %v711_v57 }
 0x1ab   : > { %v712_v61 = vadd.f32 %v702_v59, %v692_v60  ;;  %v1269_v60 = vld [vmem:[%s2066_s6 + $0xa0] sm:$0xff] }
 0x1ad   : > { %723 = vst.msk [vmem:[%s1624_s27 + $0x9] sm:$0x1] %vm713_vm3, %v712_v61 }
 0x1ae   : > { %1400 = vpush %v712_v61  ;;  %v1272_v61 = vld [vmem:[%s2066_s6 + $0xb8] sm:$0xff] }
 0x1bf   : > { %s1383_s25 = spop %1382 }
 0x1c0   : > { %v741_v5 = vstv %s1383_s25  ;;  %s1385_s21 = spop %1384 }
 0x1c1   : > { %v742_v9 = vmul.f32 %v741_v5, %v732_v62  ;;  %v743_v10 = vmul.f32 %v741_v5, %v733_v63  ;;  %v744_v11 = vmul.f32 %v741_v5, %v734_v0  ;;  %v745_v15 = vmul.f32 %v741_v5, %v735_v1  ;;  %v1279_v62 = vld [vmem:[%s2066_s6 + $0xf0] sm:$0xff] }
 0x1c2   : > { %v746_v16 = vmul.f32 %v741_v5, %v736_v2  ;;  %v747_v17 = vmul.f32 %v741_v5, %v737_v3  ;;  %v748_v18 = vmul.f32 %v741_v5, %v738_v4  ;;  %v749_v23 = vmul.f32 %v741_v5, %v739_v6  ;;  %v1274_v4 = vld [vmem:[%s2066_s6 + $0xc8] sm:$0xff]  ;;  %v1277_v5 = vld [vmem:[%s2066_s6 + $0xe0] sm:$0xff] }
 0x1c3   : > { %v768_v27 = vstv %s1385_s21  ;;  %s1387_s24 = spop %1386  ;;  %v750_v20 = vadd.f32 %v742_v9, %v724_v7  ;;  %v751_v28 = vadd.f32 %v743_v10, %v725_v8  ;;  %v752_v29 = vadd.f32 %v744_v11, %v726_v12  ;;  %v1278_v6 = vld [vmem:[%s2066_s6 + $0xe8] sm:$0xff]  ;;  %v1280_v11 = vld [vmem:[%s2066_s6 + $0xf8] sm:$0xff]  ;;  %v1287_v12 = vld [vmem:[%s2066_s6 + $0x130] sm:$0xff] }
 0x1c4   : > { %v753_v33 = vadd.f32 %v745_v15, %v727_v13  ;;  %v754_v34 = vadd.f32 %v746_v16, %v728_v14  ;;  %v755_v35 = vadd.f32 %v747_v17, %v729_v19  ;;  %v756_v36 = vadd.f32 %v748_v18, %v730_v21  ;;  %v1276_v15 = vld [vmem:[%s2066_s6 + $0xd8] sm:$0xff]  ;;  %v1286_v19 = vld [vmem:[%s2066_s6 + $0x128] sm:$0xff] }
 0x1c5   : > { %v757_v39 = vadd.f32 %v749_v23, %v731_v22  ;;  %v769_v40 = vmul.f32 %v1257_v24, %v768_v27  ;;  %v770_v41 = vmul.f32 %v1258_v25, %v768_v27  ;;  %v795_v42 = vstv %s1387_s24  ;;  %v1288_v18 = vld [vmem:[%s2066_s6 + $0x138] sm:$0xff]  ;;  %v1285_v25 = vld [vmem:[%s2066_s6 + $0x120] sm:$0xff] }
 0x1c6   : > { %v771_v43 = vmul.f32 %v1259_v26, %v768_v27  ;;  %v772_v44 = vmul.f32 %v1260_v30, %v768_v27  ;;  %v773_v45 = vmul.f32 %v1261_v31, %v768_v27  ;;  %v774_v46 = vmul.f32 %v1262_v32, %v768_v27  ;;  %v1295_v30 = vld [vmem:[%s2066_s6 + $0x170] sm:$0xff]  ;;  %v1294_v31 = vld [vmem:[%s2066_s6 + $0x168] sm:$0xff] }
 0x1c7   : > { %s1389_s15 = spop %1388  ;;  %v775_v50 = vmul.f32 %v1263_v37, %v768_v27  ;;  %v776_v51 = vmul.f32 %v1264_v38, %v768_v27  ;;  %v1761_v52 = vadd.f32 %v769_v40, %v750_v20  ;;  %v1763_v53 = vadd.f32 %v770_v41, %v751_v28  ;;  %v1296_v20 = vld [vmem:[%s2066_s6 + $0x178] sm:$0xff]  ;;  %v1303_v38 = vld [vmem:[%s2066_s6 + $0x1b0] sm:$0xff] }
 0x1c8   : > { %v1774_v57 = vadd.f32 %v771_v43, %v752_v29  ;;  %v1776_v58 = vadd.f32 %v772_v44, %v753_v33  ;;  %v781_v59 = vadd.f32 %v773_v45, %v754_v34  ;;  %v1787_v63 = vstv %s1389_s15  ;;  %v1275_v43 = vld [vmem:[%s2066_s6 + $0xd0] sm:$0xff]  ;;  %s1433_s15 = smov 1e-16  }
 0x1c9   : > { %v782_v0 = vadd.f32 %v774_v46, %v755_v35  ;;  %v783_v1 = vadd.f32 %v775_v50, %v756_v36  ;;  %v1789_v2 = vmul.f32 %v1265_v47, %v795_v42  ;;  %v802_v3 = vmul.f32 %v1271_v49, %v795_v42  ;;  %v1292_v49 = vld [vmem:[%s2066_s6 + $0x158] sm:$0xff] }
 0x1ca   : > { %v1800_v7 = vmul.f32 %v1266_v48, %v795_v42  ;;  %v1802_v8 = vmul.f32 %v1267_v54, %v795_v42  ;;  %v801_v9 = vmul.f32 %v1270_v56, %v795_v42  ;;  %v800_v13 = vmul.f32 %v1269_v60, %v795_v42  ;;  %v1284_v48 = vld [vmem:[%s2066_s6 + $0x118] sm:$0xff] }
 0x1cb   : > { %s1391_s20 = spop %1390  ;;  %v803_v14 = vmul.f32 %v1272_v61, %v795_v42  ;;  %v829_v16 = vmul.f32 %v1279_v62, %v1787_v63  ;;  %v784_v17 = vadd.f32 %v776_v51, %v757_v39  ;;  %v799_v21 = vmul.f32 %v1268_v55, %v795_v42  ;;  %v1302_v39 = vld [vmem:[%s2066_s6 + $0x1a8] sm:$0xff]  ;;  %v1293_v42 = vld [vmem:[%s2066_s6 + $0x160] sm:$0xff]  ;;  %v1304_v56 = vld [vmem:[%s2066_s6 + $0x1b8] sm:$0xff] }
 0x1cc   : > { %v1804_v10 = vstv %s1391_s20  ;;  %v1823_v22 = vmul.f32 %v1274_v4, %v1787_v63  ;;  %v827_v23 = vmul.f32 %v1277_v5, %v1787_v63  ;;  %v828_v24 = vmul.f32 %v1278_v6, %v1787_v63 }
 0x1cd   : > { %v830_v27 = vmul.f32 %v1280_v11, %v1787_v63  ;;  %v810_v28 = vadd.f32 %v802_v3, %v783_v1  ;;  %v856_v29 = vmul.f32 %v1287_v12, %v1804_v10  ;;  %v826_v32 = vmul.f32 %v1276_v15, %v1787_v63  ;;  %v1311_v12 = vld [vmem:[%s2066_s6 + $0x1f0] sm:$0xff] }
 0x1ce   : > { %v857_v33 = vmul.f32 %v1288_v18, %v1804_v10  ;;  %v809_v34 = vadd.f32 %v801_v9, %v782_v0  ;;  %v855_v35 = vmul.f32 %v1286_v19, %v1804_v10  ;;  %v811_v36 = vadd.f32 %v803_v14, %v784_v17  ;;  %v1301_v0 = vld [vmem:[%s2066_s6 + $0x1a0] sm:$0xff]  ;;  %v1312_v9 = vld [vmem:[%s2066_s6 + $0x1f8] sm:$0xff]  ;;  %v1310_v17 = vld [vmem:[%s2066_s6 + $0x1e8] sm:$0xff] }
 0x1cf   : > { %s1393_s20 = spop %1392  ;;  %v837_v37 = vadd.f32 %v829_v16, %v810_v28  ;;  %v808_v40 = vadd.f32 %v800_v13, %v781_v59  ;;  %v854_v41 = vmul.f32 %v1285_v25, %v1804_v10  ;;  %v825_v1 = vmul.f32 %v1275_v43, %v1787_v63  ;;  %v1309_v19 = vld [vmem:[%s2066_s6 + $0x1e0] sm:$0xff] }
 0x1d0   : > { %v1830_v26 = vstv %s1393_s20  ;;  %v836_v46 = vadd.f32 %v828_v24, %v809_v34  ;;  %v838_v51 = vadd.f32 %v830_v27, %v811_v36  ;;  %v807_v3 = vadd.f32 %v799_v21, %v1776_v58  ;;  %v1300_v58 = vld [vmem:[%s2066_s6 + $0x198] sm:$0xff]  ;;  %v1318_v36 = vld [vmem:[%s2066_s6 + $0x228] sm:$0xff] }
 0x1d1   : > { %v884_v44 = vmul.f32 %v1296_v20, %v1830_v26  ;;  %v883_v45 = vmul.f32 %v1295_v30, %v1830_v26  ;;  %v882_v47 = vmul.f32 %v1294_v31, %v1830_v26  ;;  %v864_v54 = vadd.f32 %v856_v29, %v837_v37  ;;  %v1320_v29 = vld [vmem:[%s2066_s6 + $0x238] sm:$0xff]  ;;  %v1319_v31 = vld [vmem:[%s2066_s6 + $0x230] sm:$0xff] }
 0x1d2   : > { %v835_v55 = vadd.f32 %v827_v23, %v808_v40  ;;  %v863_v60 = vadd.f32 %v855_v35, %v836_v46  ;;  %v881_v62 = vmul.f32 %v1293_v42, %v1830_v26  ;;  %v853_v4 = vmul.f32 %v1284_v48, %v1804_v10  ;;  %v1283_v23 = vld [vmem:[%s2066_s6 + $0x110] sm:$0xff]  ;;  %v1308_v34 = vld [vmem:[%s2066_s6 + $0x1d8] sm:$0xff] }
 0x1d3   : > { %s1395_s20 = spop %1394  ;;  %v880_v5 = vmul.f32 %v1292_v49, %v1830_v26  ;;  %v865_v6 = vadd.f32 %v857_v33, %v838_v51  ;;  %v891_v11 = vadd.f32 %v883_v45, %v864_v54  ;;  %v834_v21 = vadd.f32 %v826_v32, %v807_v3  ;;  %v1291_v40 = vld [vmem:[%s2066_s6 + $0x150] sm:$0xff]  ;;  %v1328_v51 = vld [vmem:[%s2066_s6 + $0x278] sm:$0xff] }
 0x1d4   : > { %v1868_v50 = vstv %s1395_s20  ;;  %v890_v13 = vadd.f32 %v882_v47, %v863_v60  ;;  %v862_v14 = vadd.f32 %v854_v41, %v835_v55  ;;  %v1317_v47 = vld [vmem:[%s2066_s6 + $0x220] sm:$0xff]  ;;  %v1299_v48 = vld [vmem:[%s2066_s6 + $0x190] sm:$0xff]  ;;  %v879_v60 = vmul.f32 %v1291_v40, %v1830_v26 }
 0x1d5   : > { %v910_v59 = vmul.f32 %v1303_v38, %v1868_v50  ;;  %v909_v61 = vmul.f32 %v1302_v39, %v1868_v50  ;;  %v911_v16 = vmul.f32 %v1304_v56, %v1868_v50  ;;  %v908_v18 = vmul.f32 %v1301_v0, %v1868_v50  ;;  %v1327_v55 = vld [vmem:[%s2066_s6 + $0x270] sm:$0xff] }
 0x1d6   : > { %v892_v24 = vadd.f32 %v884_v44, %v865_v6  ;;  %v889_v20 = vadd.f32 %v881_v62, %v862_v14  ;;  %v861_v32 = vadd.f32 %v853_v4, %v834_v21  ;;  %v907_v33 = vmul.f32 %v1300_v58, %v1868_v50 }
 0x1d7   : > { %s1397_s29 = spop %1396  ;;  %v918_v25 = vadd.f32 %v910_v59, %v891_v11  ;;  %v917_v27 = vadd.f32 %v909_v61, %v890_v13  ;;  %v806_v38 = vadd.f32 %v1802_v8, %v1774_v57  ;;  %v852_v39 = vmul.f32 %v1283_v23, %v1804_v10  ;;  %v1326_v59 = vld [vmem:[%s2066_s6 + $0x268] sm:$0xff]  ;;  %v1324_v23 = vld [vmem:[%s2066_s6 + $0x258] sm:$0xff] }
 0x1d8   : > { %v1892_v15 = vstv %s1397_s29  ;;  %v919_v42 = vadd.f32 %v911_v16, %v892_v24  ;;  %v916_v43 = vadd.f32 %v908_v18, %v889_v20  ;;  %v888_v44 = vadd.f32 %v880_v5, %v861_v32 }
 0x1d9   : > { %v938_v28 = vmul.f32 %v1312_v9, %v1892_v15  ;;  %v937_v30 = vmul.f32 %v1311_v12, %v1892_v15  ;;  %v936_v35 = vmul.f32 %v1310_v17, %v1892_v15  ;;  %v935_v37 = vmul.f32 %v1309_v19, %v1892_v15  ;;  %v1325_v9 = vld [vmem:[%s2066_s6 + $0x260] sm:$0xff]  ;;  %v1307_v12 = vld [vmem:[%s2066_s6 + $0x1d0] sm:$0xff]  ;;  %v1282_v17 = vld [vmem:[%s2066_s6 + $0x108] sm:$0xff] }
 0x1da   : > { %v934_v57 = vmul.f32 %v1308_v34, %v1892_v15  ;;  %v833_v8 = vadd.f32 %v825_v1, %v806_v38  ;;  %v915_v0 = vadd.f32 %v907_v33, %v888_v44  ;;  %v1316_v1 = vld [vmem:[%s2066_s6 + $0x218] sm:$0xff]  ;;  %v906_v11 = vmul.f32 %v1299_v48, %v1868_v50  ;;  %v1323_v34 = vld [vmem:[%s2066_s6 + $0x250] sm:$0xff]  ;;  %v1306_v48 = vld [vmem:[%s2066_s6 + $0x1c8] sm:$0xff] }
 0x1db   : > { %s1399_s21 = spop %1398  ;;  %v946_v49 = vadd.f32 %v938_v28, %v919_v42  ;;  %v945_v54 = vadd.f32 %v937_v30, %v918_v25  ;;  %v944_v61 = vadd.f32 %v936_v35, %v917_v27  ;;  %v943_v62 = vadd.f32 %v935_v37, %v916_v43  ;;  %v1315_v25 = vld [vmem:[%s2066_s6 + $0x210] sm:$0xff]  ;;  %v1273_v27 = vld [vmem:[%s2066_s6 + $0xc0] sm:$0xff]  ;;  %v1298_v42 = vld [vmem:[%s2066_s6 + $0x188] sm:$0xff] }
 0x1dc   : > { %v1928_v41 = vstv %s1399_s21  ;;  %v860_v3 = vadd.f32 %v852_v39, %v833_v8  ;;  %v942_v19 = vadd.f32 %v934_v57, %v915_v0  ;;  %v933_v30 = vmul.f32 %v1307_v12, %v1892_v15  ;;  %v1281_v43 = vld [vmem:[%s2066_s6 + $0x100] sm:$0xff] }
 0x1dd   : > { %v965_v45 = vmul.f32 %v1320_v29, %v1928_v41  ;;  %v964_v46 = vmul.f32 %v1319_v31, %v1928_v41  ;;  %v963_v56 = vmul.f32 %v1318_v36, %v1928_v41  ;;  %v962_v6 = vmul.f32 %v1317_v47, %v1928_v41  ;;  %v1290_v31 = vld [vmem:[%s2066_s6 + $0x148] sm:$0xff] }
 0x1de   : > { %v961_v21 = vmul.f32 %v1316_v1, %v1928_v41  ;;  %v887_v24 = vadd.f32 %v879_v60, %v860_v3  ;;  %v805_v35 = vadd.f32 %v1800_v7, %v1763_v53  ;;  %v851_v36 = vmul.f32 %v1282_v17, %v1804_v10  ;;  %v1314_v60 = vld [vmem:[%s2066_s6 + $0x208] sm:$0xff] }
 0x1df   : > { %s1401_s29 = spop %1400  ;;  %v973_v5 = vadd.f32 %v965_v45, %v946_v49  ;;  %v972_v14 = vadd.f32 %v964_v46, %v945_v54  ;;  %v971_v18 = vadd.f32 %v963_v56, %v944_v61  ;;  %v970_v32 = vadd.f32 %v962_v6, %v943_v62  ;;  %v1289_v49 = vld [vmem:[%s2066_s6 + $0x140] sm:$0xff]  ;;  %v1322_v3 = vld [vmem:[%s2066_s6 + $0x248] sm:$0xff] }
 0x1e0   : > { %v1953_v4 = vstv %s1401_s29  ;;  %v914_v33 = vadd.f32 %v906_v11, %v887_v24  ;;  %v960_v40 = vmul.f32 %v1315_v25, %v1928_v41  ;;  %v823_v44 = vmul.f32 %v1273_v27, %v1787_v63  ;;  %v1297_v61 = vld [vmem:[%s2066_s6 + $0x180] sm:$0xff] }
 0x1e1   : > { %v992_v13 = vmul.f32 %v1328_v51, %v1953_v4  ;;  %v991_v58 = vmul.f32 %v1327_v55, %v1953_v4  ;;  %v990_v16 = vmul.f32 %v1326_v59, %v1953_v4  ;;  %v989_v29 = vmul.f32 %v1325_v9, %v1953_v4 }
 0x1e2   : > { %v988_v39 = vmul.f32 %v1324_v23, %v1953_v4  ;;  %v969_v45 = vadd.f32 %v961_v21, %v942_v19  ;;  %v832_v53 = vadd.f32 %v1823_v22, %v805_v35  ;;  %v878_v7 = vmul.f32 %v1290_v31, %v1830_v26  ;;  %v1321_v19 = vld [vmem:[%s2066_s6 + $0x240] sm:$0xff] }
 0x1e3   : > { %v1000_v20 = vadd.f32 %v992_v13, %v973_v5  ;;  %v999_v28 = vadd.f32 %v991_v58, %v972_v14  ;;  %v998_v38 = vadd.f32 %v990_v16, %v971_v18  ;;  %v997_v47 = vadd.f32 %v989_v29, %v970_v32  ;;  %v1305_v5 = vld [vmem:[%s2066_s6 + $0x1c0] sm:$0xff] }
 0x1e4   : > { %v941_v57 = vadd.f32 %v933_v30, %v914_v33  ;;  %v987_v8 = vmul.f32 %v1323_v34, %v1953_v4  ;;  %v859_v63 = vadd.f32 %v851_v36, %v832_v53  ;;  %v905_v22 = vmul.f32 %v1298_v42, %v1868_v50  ;;  %v1313_v13 = vld [vmem:[%s2066_s6 + $0x200] sm:$0xff]  ;;  %v1010_v30 = vld [vmem:[%s2068_s8 + $0x8] sm:$0xf]  ;;  %v1021_v36 = vpop.permute.xlu0 %1020 }
 0x1e5   : > { %v1008_v37 = vmax.f32 %v1000_v20, 0.0  ;;  %v1007_v46 = vmax.f32 %v999_v28, 0.0  ;;  %v804_v51 = vadd.f32 %v1789_v2, %v1761_v52  ;;  %v850_v54 = vmul.f32 %v1281_v43, %v1804_v10 }
 0x1e6   : > { %v1006_v55 = vmax.f32 %v998_v38, 0.0  ;;  %v996_v56 = vadd.f32 %v988_v39, %v969_v45  ;;  %v968_v59 = vadd.f32 %v960_v40, %v941_v57  ;;  %v886_v62 = vadd.f32 %v878_v7, %v859_v63  ;;  %v1016_v38 = vpop.permute.xlu1 %1015 }
 0x1e7   : > { %1362 = vmatprep.subr.mxu1 %v1008_v37  ;;  %v932_v0 = vmul.f32 %v1306_v48, %v1892_v15  ;;  %v831_v1 = vadd.f32 %v823_v44, %v804_v51  ;;  %v877_v52 = vmul.f32 %v1289_v49, %v1830_v26  ;;  %v1005_v2 = vmax.f32 %v997_v47, 0.0 }
 0x1e8   : > { %1363 = vmatpush3.msra.mxu1 %v1008_v37  ;;  %v995_v10 = vadd.f32 %v987_v8, %v968_v59  ;;  %v913_v6 = vadd.f32 %v905_v22, %v886_v62  ;;  %v959_v9 = vmul.f32 %v1314_v60, %v1928_v41  ;;  %v904_v12 = vmul.f32 %v1297_v61, %v1868_v50 }
 0x1e9   : > { %1364 = vmatprep.subr.mxu1 %v1007_v46  ;;  %v858_v11 = vadd.f32 %v850_v54, %v831_v1  ;;  %v1004_v26 = vmax.f32 %v996_v56, 0.0  ;;  %v986_v58 = vmul.f32 %v1322_v3, %v1953_v4  ;;  %v931_v17 = vmul.f32 %v1305_v5, %v1892_v15 }
 0x1ea   : > { %1365 = vmatpush3.msra.mxu1 %v1007_v46  ;;  %v940_v14 = vadd.f32 %v932_v0, %v913_v6  ;;  %v1003_v18 = vmax.f32 %v995_v10, 0.0  ;;  %v958_v23 = vmul.f32 %v1313_v13, %v1928_v41  ;;  %v985_v27 = vmul.f32 %v1321_v19, %v1953_v4  ;;  %v419_v41 = vld [vmem:[%s406_s23 + $0x8] sm:$0xf]  ;;  %v418_v4 = vld [vmem:[%s406_s23] sm:$0xff] }
 0x1eb   : > { %1366 = vmatprep.subr.mxu1 %v1006_v55  ;;  %v885_v16 = vadd.f32 %v877_v52, %v858_v11  ;;  %v1119_v31 = vmul.f32 %v418_v4, %v418_v4  ;;  %v1120_v32 = vmul.f32 %v419_v41, %v419_v41 }
 0x1ec   : > { %1367 = vmatpush3.msra.mxu1 %v1006_v55  ;;  %v967_v50 = vadd.f32 %v959_v9, %v940_v14 }
 0x1ed   : > { %1368 = vmatprep.subr.mxu1 %v1005_v2  ;;  %v912_v21 = vadd.f32 %v904_v12, %v885_v16  ;;  %v1121_v33 = vsel %vm562_vm2, %v1119_v31, 0.0  ;;  %v1122_v34 = vsel %vm1107_vm4, %v1120_v32, 0.0 }
 0x1ee   : > { %1369 = vmatpush3.msra.mxu1 %v1005_v2  ;;  %v994_v24 = vadd.f32 %v986_v58, %v967_v50  ;;  %v1123_v35 = vadd.f32 %v1122_v34, %v1121_v33 }
 0x1ef   : > { %1370 = vmatprep.subr.mxu1 %v1004_v26  ;;  %v939_v25 = vadd.f32 %v931_v17, %v912_v21 }
 0x1f0   : > { %1371 = vmatpush3.msra.mxu1 %v1004_v26  ;;  %v1002_v20 = vmax.f32 %v994_v24, 0.0  ;;  %1124 = vadd.xlane.f32.xlu0 %v1123_v35 }
 0x1f1   : > { %1372 = vmatprep.subr.mxu1 %v1003_v18  ;;  %v966_v15 = vadd.f32 %v958_v23, %v939_v25 }
 0x1f2   : > { %1373 = vmatpush3.msra.mxu1 %v1003_v18 }
 0x1f3   : > { %1374 = vmatprep.subr.mxu1 %v1002_v20  ;;  %v993_v28 = vadd.f32 %v985_v27, %v966_v15 }
 0x1f4   : > { %1375 = vmatpush3.msra.mxu1 %v1002_v20 }
 0x1f5   : > { %v1001_v29 = vmax.f32 %v993_v28, 0.0 }
 0x1f7   : > { %1376 = vmatprep.subr.mxu1 %v1001_v29 }
 0x1f8   : > { %1377 = vmatpush3.msra.mxu1 %v1001_v29 }
 0x1f9   : > { %1379 = vmatmul.mubr.msk.f32.vlgmr.msra.gmra.mxu1 %vm562_vm2, %v1010_v30 }
 0x279   : > { %v1125_v49 = vpop.xlane.xlu0 %1124 }
 0x27a   : > { %v1126_v63 = vrot.slane %v1125_v49, 4 }
 0x27c   : > { %v1127_v22 = vadd.f32 %v1126_v63, %v1125_v49 }
 0x27e   : > { %v1128_v51 = vrot.slane %v1127_v22, 2 }
 0x280   : > { %v1129_v59 = vadd.f32 %v1128_v51, %v1127_v22 }
 0x282   : > { %v1130_v52 = vrot.slane %v1129_v59, 1 }
 0x284   : > { %v1131_v6 = vadd.f32 %v1130_v52, %v1129_v59 }
 0x2b9   : > { %v1380_v37 = vpop.f32.mrf.mxu1 }
 0x2ba   : > { %v1101_v39 = vadd.f32 %v1380_v37, %v1021_v36 }
 0x2bb   : > { %v1095_v40 = vpop.f32.mrf.mxu1 }
 0x2bc   : > { %v1105_v42 = vmul.f32 %v1101_v39, %v419_v41  ;;  %v1096_v43 = vadd.f32 %v1095_v40, %v1016_v38  ;;  %v1134_v53 = vmul.f32 %v1101_v39, %v1101_v39 }
 0x2be   : > { %v1104_v44 = vmul.f32 %v1096_v43, %v418_v4  ;;  %v1133_v45 = vmul.f32 %v1096_v43, %v1096_v43  ;;  %v1108_v46 = vsel %vm1107_vm4, %v1105_v42, 0.0  ;;  %v1136_v8 = vsel %vm1107_vm4, %v1134_v53, 0.0 }
 0x2c0   : > { %v1106_v7 = vsel %vm562_vm2, %v1104_v44, 0.0  ;;  %v1135_v57 = vsel %vm562_vm2, %v1133_v45, 0.0 }
 0x2c1   : > { %v1109_v47 = vadd.f32 %v1108_v46, %v1106_v7  ;;  %v1137_v48 = vadd.f32 %v1136_v8, %v1135_v57 }
 0x2c3   : > { %1110 = vadd.xlane.f32.xlu1 %v1109_v47 }
 0x2c7   : > { %1138 = vadd.xlane.f32.xlu1 %v1137_v48 }
 0x34c   : > { %v1111_v54 = vpop.xlane.xlu1 %1110 }
 0x34d   : > { %v1112_v55 = vrot.slane %v1111_v54, 4 }
 0x34f   : > { %v1113_v56 = vadd.f32 %v1112_v55, %v1111_v54 }
 0x350   : > { %v1139_v60 = vpop.xlane.xlu1 %1138 }
 0x351   : > { %v1114_v61 = vrot.slane %v1113_v56, 2  ;;  %v1140_v62 = vrot.slane %v1139_v60, 4 }
 0x353   : > { %v1141_v0 = vadd.f32 %v1140_v62, %v1139_v60  ;;  %v1115_v1 = vadd.f32 %v1114_v61, %v1113_v56 }
 0x355   : > { %v1142_v2 = vrot.slane %v1141_v0, 2  ;;  %v1116_v10 = vrot.slane %v1115_v1, 1 }
 0x357   : > { %v1143_v3 = vadd.f32 %v1142_v2, %v1141_v0  ;;  %v1117_v5 = vadd.f32 %v1116_v10, %v1115_v1 }
 0x359   : > { %1402 = vpush %v1117_v5  ;;  %v1144_v9 = vrot.slane %v1143_v3, 1 }
 0x35a   : > { %1404 = vpush %v1131_v6 }
 0x35b   : > { %v1145_v11 = vadd.f32 %v1144_v9, %v1143_v3 }
 0x35d   : > { %1406 = vpush %v1145_v11 }
 0x38a   : > { %s1403_s25 = spop %1402 }
 0x38b   : > { %s1405_s24 = spop %1404 }
 0x38e   : > { %s1407_s26 = spop %1406 }
 0x38f   : > { %s1147_s27 = smul.f32 %s1407_s26, %s1405_s24 }
 0x391   : > { %s1148_s28 = smax.f32 %s1433_s15, %s1147_s27 }
 0x392   : > { %v1149_v12 = vstv %s1148_s28 }
 0x393   : > { %1422 = vrsqrt.f32 %v1149_v12 }
 0x3a0   : > { %v1423_v26 = vpop.eup %1422 }
 0x3a1   : > { %1408 = vpush %v1423_v26 }
 0x3d2   : > { %s1409_s29 = spop %1408 }
 0x3d3   : > { %s1152_s13 = smul.f32 %s1409_s29, %s1403_s25 }
 0x3d5   : > { %v1153_v13 = vstv %s1152_s13 }
 0x3d6   : > { %1154 = vst.msk [vmem:[%s413_s12] sm:$0x1] %vm713_vm3, %v1153_v13 }
 0x3d7 PF: > { %s22_s17 = sadd.s32 1, %s1430_s17  }
 0x3d8   : > { %p19_p4 = scmp.ge.s32.totalorder %s22_s17, 4  }
 0x3da   :  { %21 = sbr.rel (!%p19_p4) target bundleno = 1 (0x1), region = 114 }

</bundles_post_ra>
